<compile_context>
chip_gen: v6e
topology: v6e:2x2x1
jax: 0.10.0
libtpu: 0.0.40
codegen_flags: <defaults>
</compile_context>

<pallas_src>
import functools

import jax
import jax.numpy as jnp
from jax.experimental import pallas as pl
from jax.experimental.pallas import tpu as pltpu

KERNEL = 3        # variance_predictor.kernel_size ('same' conv, pad = 1)
LN_EPS = 1e-5     # nn.LayerNorm default eps
ROWS_CAP = 8192   # per-grid-step row budget (fits default scoped VMEM everywhere)


def _choose_b_tile(batch, t_len, cap=ROWS_CAP):
    """Largest divisor of `batch` whose row block (b_tile*T) is sublane-aligned
    and under the VMEM row cap, while keeping >= 2 grid steps (v7x megacore).
    Falls back to the whole batch (full-extent block, always legal)."""
    candidates = [d for d in range(1, batch)
                  if batch % d == 0 and (d * t_len) % 8 == 0
                  and d * t_len <= cap]
    if candidates:
        return max(candidates)
    return batch


def _vp_kernel(t_len, x_ref, keep_ref, w1_ref, w2_ref, pp_ref, out_ref):
    rows, _ = x_ref.shape
    f_out = pp_ref.shape[1]
    b_tile = rows // t_len
    inv_f = 1.0 / float(f_out)

    # Packed per-channel params: rows = b1, g1, be1, b2, g2, be2, wl, bl.
    b1, g1, be1 = pp_ref[0:1, :], pp_ref[1:2, :], pp_ref[2:3, :]
    b2, g2, be2 = pp_ref[3:4, :], pp_ref[4:5, :], pp_ref[5:6, :]
    wl = pp_ref[6:7, :]                                   # (1, F)
    bl = pp_ref[7:8, 0:1]                                 # (1, 1)

    # Per-row time index inside the flattened (b_tile * T) row block; conv taps
    # that would cross a sequence boundary are zeroed ('same' zero padding).
    t_idx = jax.lax.broadcasted_iota(jnp.int32, (b_tile, t_len, 1), 1)
    t_idx = t_idx.reshape(rows, 1)
    is_first = t_idx == 0
    is_last = t_idx == t_len - 1

    def shifted_taps(h):
        # h: (rows, C) f32.  XLU sublane rotations instead of slice+concat
        # copies; the wrapped rows land exactly on the zeroed boundaries.
        prv = pltpu.roll(h, shift=1, axis=0)              # prv[r] = h[r-1]
        nxt = pltpu.roll(h, shift=rows - 1, axis=0)       # nxt[r] = h[r+1]
        prv = jnp.where(is_first, 0.0, prv)
        nxt = jnp.where(is_last, 0.0, nxt)
        return prv.astype(jnp.bfloat16), nxt.astype(jnp.bfloat16)

    def conv_k3(cur_bf, prv_bf, nxt_bf, w_ref, bias):
        # k=3 'same' conv as three tap matmuls (K = C_in): no im2col slab, no
        # channel-padded weights; bf16 operands, f32 accumulation on the MXU.
        acc = jnp.dot(prv_bf, w_ref[0], preferred_element_type=jnp.float32)
        acc += jnp.dot(cur_bf, w_ref[1], preferred_element_type=jnp.float32)
        acc += jnp.dot(nxt_bf, w_ref[2], preferred_element_type=jnp.float32)
        return acc + bias

    def relu_ln(acc, gamma, beta):
        acc = jnp.maximum(acc, 0.0)                       # ReLU
        mu = jnp.sum(acc, axis=-1, keepdims=True) * inv_f
        d = acc - mu
        var = jnp.sum(d * d, axis=-1, keepdims=True) * inv_f
        return d * jax.lax.rsqrt(var + LN_EPS) * gamma + beta

    # conv1d_1 -> ReLU -> LayerNorm
    x_bf = x_ref[...]                                     # (rows, H) bf16
    prv, nxt = shifted_taps(x_bf.astype(jnp.float32))
    h = relu_ln(conv_k3(x_bf, prv, nxt, w1_ref, b1), g1, be1)
    # TODO(synk): dropout_1 / dropout_2 are identity (inference semantics).

    # conv1d_2 -> ReLU -> LayerNorm
    prv, nxt = shifted_taps(h)
    h = relu_ln(conv_k3(h.astype(jnp.bfloat16), prv, nxt, w2_ref, b2), g2, be2)

    # Linear(F -> 1): contraction over F with rows on the lane axis of the
    # result -> lane-dense (1, rows) output, no f32 transpose materialized.
    y = jax.lax.dot_general(
        wl.astype(jnp.bfloat16), h.astype(jnp.bfloat16),
        dimension_numbers=(((1,), (1,)), ((), ())),
        preferred_element_type=jnp.float32) + bl          # (1, rows)

    # masked_fill(t >= length, 0.0) using the precomputed lane-dense keep flag.
    out_ref[0] = jnp.where(keep_ref[0] != 0, y, 0.0)


def variance_predictor(x, lengths, params):
    """x: (B, T, H) f32, lengths: (B,) int (valid frames per sequence).

    Returns (B, T) f32 with positions t >= lengths[b] set to 0.0, matching
    VariancePredictor.forward(encoder_output, mask) with mask[b,t] = t >= len.
    """
    B, T, H = x.shape
    F_ = params["w1"].shape[2]

    b_tile = _choose_b_tile(B, T)
    num_steps = B // b_tile
    rows = b_tile * T

    # x is only ever consumed as the bf16 MXU operand of conv1: ship it bf16
    # with its real channel count, pre-flattened to the kernel's row layout.
    x_rows = x.reshape(B * T, H).astype(jnp.bfloat16)

    # Conv weights (K, C_in, C_out) in bf16, consumed per-tap in the kernel.
    w1 = params["w1"].astype(jnp.bfloat16)
    w2 = params["w2"].astype(jnp.bfloat16)

    # Six per-channel vectors + linear weight/bias packed into one tiny block.
    def row(v):
        return v.reshape(-1).astype(jnp.float32)

    packed = jnp.stack([
        row(params["b1"]), row(params["g1"]), row(params["be1"]),
        row(params["b2"]), row(params["g2"]), row(params["be2"]),
        row(params["wl"]),                                  # (F,1) -> row
        jnp.pad(params["bl"].reshape(-1).astype(jnp.float32), (0, F_ - 1)),
    ], axis=0)                                              # (8, F) f32

    # Lane-dense per-row keep flag (the masked_fill mask), built on the host.
    keep = (jnp.arange(T, dtype=jnp.int32)[None, :]
            < jnp.asarray(lengths, jnp.int32)[:, None]).astype(jnp.int32)
    keep = keep.reshape(num_steps, 1, rows)

    out = pl.pallas_call(
        functools.partial(_vp_kernel, T),
        out_shape=jax.ShapeDtypeStruct((num_steps, 1, rows), jnp.float32),
        grid=(num_steps,),
        in_specs=[
            pl.BlockSpec((rows, H), lambda i: (i, 0)),             # x rows
            pl.BlockSpec((1, 1, rows), lambda i: (i, 0, 0)),       # keep flags
            pl.BlockSpec((KERNEL, H, F_), lambda i: (0, 0, 0)),    # conv1 W
            pl.BlockSpec((KERNEL, F_, F_), lambda i: (0, 0, 0)),   # conv2 W
            pl.BlockSpec((8, F_), lambda i: (0, 0)),               # packed params
        ],
        out_specs=pl.BlockSpec((1, 1, rows), lambda i: (i, 0, 0)),
        compiler_params=pltpu.CompilerParams(
            dimension_semantics=("parallel",)),
    )(x_rows, keep, w1, w2, packed)

    return out.reshape(B, T)


def init_params(key, H, F_):
    ks = jax.random.split(key, 3)

    def xavier(k, shape, fan_in, fan_out):
        std = (2.0 / (fan_in + fan_out)) ** 0.5
        return std * jax.random.normal(k, shape, jnp.float32)

    return dict(
        w1=xavier(ks[0], (KERNEL, H, F_), H * KERNEL, F_ * KERNEL),
        b1=jnp.full((1, F_), 0.01, jnp.float32),
        g1=jnp.ones((1, F_), jnp.float32),
        be1=jnp.zeros((1, F_), jnp.float32),
        w2=xavier(ks[1], (KERNEL, F_, F_), F_ * KERNEL, F_ * KERNEL),
        b2=jnp.full((1, F_), -0.01, jnp.float32),
        g2=jnp.ones((1, F_), jnp.float32),
        be2=jnp.zeros((1, F_), jnp.float32),
        wl=xavier(ks[2], (F_, 1), F_, 1),
        bl=jnp.full((1, 1), 0.1, jnp.float32),
    )


def reference(x, lengths, p):
    """Pure-JAX reference reproducing the PyTorch forward (eval mode).

    Matmul inputs are cast to bf16 (f32 accumulation) to mirror the kernel's
    MXU usage -- a deliberate precision trade-off vs. PyTorch's f32 convs;
    all other math is f32.
    """
    B, T, _ = x.shape

    def conv(h, w, b):
        hp = jnp.pad(h, ((0, 0), (1, 1), (0, 0)))
        acc = jnp.zeros(h.shape[:2] + (w.shape[2],), jnp.float32) + b.reshape(1, 1, -1)
        for k in range(KERNEL):
            acc = acc + jnp.einsum(
                "btc,cf->btf",
                hp[:, k:k + T].astype(jnp.bfloat16),
                w[k].astype(jnp.bfloat16),
                preferred_element_type=jnp.float32)
        return acc

    def ln(h, g, b):
        mu = jnp.mean(h, axis=-1, keepdims=True)
        var = jnp.mean((h - mu) ** 2, axis=-1, keepdims=True)
        return ((h - mu) * jax.lax.rsqrt(var + LN_EPS)
                * g.reshape(1, 1, -1) + b.reshape(1, 1, -1))

    h = ln(jnp.maximum(conv(x, p["w1"], p["b1"]), 0.0), p["g1"], p["be1"])
    h = ln(jnp.maximum(conv(h, p["w2"], p["b2"]), 0.0), p["g2"], p["be2"])
    y = jnp.einsum("btf,f->bt",
                   h.astype(jnp.bfloat16),
                   p["wl"].reshape(-1).astype(jnp.bfloat16),
                   preferred_element_type=jnp.float32) + p["bl"].reshape(())
    mask = jnp.arange(T)[None, :] >= jnp.asarray(lengths, jnp.int32)[:, None]
    return jnp.where(mask, 0.0, y)


if __name__ == "__main__":
    # encoder_hidden = 32, filter_size = 32, kernel_size = 3
    B, T, H, F_ = 2, 8, 32, 32

    key = jax.random.PRNGKey(0)
    kx, kp = jax.random.split(key)
    x = jax.random.normal(kx, (B, T, H), jnp.float32)
    lengths = jnp.array([T, 5], jnp.int32)     # mask[b, t] = t >= lengths[b]

    params = init_params(kp, H, F_)

    out = variance_predictor(x, lengths, params)
    jax.block_until_ready(out)

    ref = reference(x, lengths, params)
    assert out.shape == (B, T)
    # bf16 MXU inputs with f32 accumulation in both kernel and reference; the
    # tolerance covers residual bf16 rounding / accumulation-order effects.
    assert jnp.allclose(out, ref, atol=1e-2, rtol=1e-2), (out, ref)

    print("KERNEL_OK")
</pallas_src>

<mosaic_0001>
module attributes {stable_mosaic.version = 11 : i64} {
  func.func @_vp_kernel(%arg0: i32, %arg1: memref<8x32xbf16, #tpu.memory_space<vmem>>, %arg2: memref<1x1x8xi32, #tpu.memory_space<vmem>>, %arg3: memref<3x32x32xbf16, #tpu.memory_space<vmem>>, %arg4: memref<3x32x32xbf16, #tpu.memory_space<vmem>>, %arg5: memref<8x32xf32, #tpu.memory_space<vmem>>, %arg6: memref<1x1x8xf32, #tpu.memory_space<vmem>>) attributes {dimension_semantics = [#tpu.dimension_semantics<parallel>], iteration_bounds = array<i64: 2>, scalar_prefetch = 0 : i64, scratch_operands = 0 : i64, tpu.core_type = #tpu.core_type<tc>, window_params = [{transform_indices = @transform_0, window_bounds = array<i64: 8, 32>}, {transform_indices = @transform_1, window_bounds = array<i64: 1, 1, 8>}, {pipeline_mode = #tpu.pipeline_mode<synchronous>, transform_indices = @transform_2, window_bounds = array<i64: 3, 32, 32>}, {pipeline_mode = #tpu.pipeline_mode<synchronous>, transform_indices = @transform_3, window_bounds = array<i64: 3, 32, 32>}, {pipeline_mode = #tpu.pipeline_mode<synchronous>, transform_indices = @transform_4, window_bounds = array<i64: 8, 32>}, {transform_indices = @transform_5, window_bounds = array<i64: 1, 1, 8>}]} {
    %c0 = arith.constant 0 : index
    %c0_0 = arith.constant 0 : index
    %0 = vector.load %arg5[%c0, %c0_0] : memref<8x32xf32, #tpu.memory_space<vmem>>, vector<1x32xf32>
    %c1 = arith.constant 1 : index
    %c0_1 = arith.constant 0 : index
    %1 = vector.load %arg5[%c1, %c0_1] : memref<8x32xf32, #tpu.memory_space<vmem>>, vector<1x32xf32>
    %c2 = arith.constant 2 : index
    %c0_2 = arith.constant 0 : index
    %2 = vector.load %arg5[%c2, %c0_2] : memref<8x32xf32, #tpu.memory_space<vmem>>, vector<1x32xf32>
    %c3 = arith.constant 3 : index
    %c0_3 = arith.constant 0 : index
    %3 = vector.load %arg5[%c3, %c0_3] : memref<8x32xf32, #tpu.memory_space<vmem>>, vector<1x32xf32>
    %c4 = arith.constant 4 : index
    %c0_4 = arith.constant 0 : index
    %4 = vector.load %arg5[%c4, %c0_4] : memref<8x32xf32, #tpu.memory_space<vmem>>, vector<1x32xf32>
    %c5 = arith.constant 5 : index
    %c0_5 = arith.constant 0 : index
    %5 = vector.load %arg5[%c5, %c0_5] : memref<8x32xf32, #tpu.memory_space<vmem>>, vector<1x32xf32>
    %c6 = arith.constant 6 : index
    %c0_6 = arith.constant 0 : index
    %6 = vector.load %arg5[%c6, %c0_6] : memref<8x32xf32, #tpu.memory_space<vmem>>, vector<1x32xf32>
    %c7 = arith.constant 7 : index
    %c0_7 = arith.constant 0 : index
    %7 = vector.load %arg5[%c7, %c0_7] : memref<8x32xf32, #tpu.memory_space<vmem>>, vector<1x1xf32>
    %8 = tpu.iota {dimensions = array<i32: 1>} : vector<1x8x1xi32>
    %9 = vector.shape_cast %8 : vector<1x8x1xi32> to vector<8x1xi32>
    %c0_i32 = arith.constant 0 : i32
    %10 = vector.broadcast %c0_i32 : i32 to vector<8x1xi32>
    %11 = arith.cmpi eq, %9, %10 : vector<8x1xi32>
    %c7_i32 = arith.constant 7 : i32
    %12 = vector.broadcast %c7_i32 : i32 to vector<8x1xi32>
    %13 = arith.cmpi eq, %9, %12 : vector<8x1xi32>
    %c0_8 = arith.constant 0 : index
    %c0_9 = arith.constant 0 : index
    %14 = vector.load %arg1[%c0_8, %c0_9] : memref<8x32xbf16, #tpu.memory_space<vmem>>, vector<8x32xbf16>
    %15 = arith.extf %14 : vector<8x32xbf16> to vector<8x32xf32>
    %c1_i32 = arith.constant 1 : i32
    %16 = tpu.dynamic_rotate %15 by %c1_i32 dim 0 : vector<8x32xf32>, i32 -> vector<8x32xf32>
    %c7_i32_10 = arith.constant 7 : i32
    %17 = tpu.dynamic_rotate %15 by %c7_i32_10 dim 0 : vector<8x32xf32>, i32 -> vector<8x32xf32>
    %cst = arith.constant 0.000000e+00 : f32
    %18 = vector.shape_cast %11 : vector<8x1xi1> to vector<8x1xi1>
    %19 = vector.broadcast %18 : vector<8x1xi1> to vector<8x32xi1>
    %20 = vector.broadcast %cst : f32 to vector<8x32xf32>
    %21 = arith.select %19, %20, %16 : vector<8x32xi1>, vector<8x32xf32>
    %cst_11 = arith.constant 0.000000e+00 : f32
    %22 = vector.shape_cast %13 : vector<8x1xi1> to vector<8x1xi1>
    %23 = vector.broadcast %22 : vector<8x1xi1> to vector<8x32xi1>
    %24 = vector.broadcast %cst_11 : f32 to vector<8x32xf32>
    %25 = arith.select %23, %24, %17 : vector<8x32xi1>, vector<8x32xf32>
    %26 = arith.truncf %21 : vector<8x32xf32> to vector<8x32xbf16>
    %27 = arith.truncf %25 : vector<8x32xf32> to vector<8x32xbf16>
    %c0_12 = arith.constant 0 : index
    %c0_13 = arith.constant 0 : index
    %c0_14 = arith.constant 0 : index
    %28 = vector.load %arg3[%c0_12, %c0_13, %c0_14] : memref<3x32x32xbf16, #tpu.memory_space<vmem>>, vector<1x32x32xbf16>
    %29 = vector.shape_cast %28 : vector<1x32x32xbf16> to vector<32x32xbf16>
    %cst_15 = arith.constant dense<0.000000e+00> : vector<8x32xf32>
    %30 = tpu.matmul %26, %29, %cst_15 {dimension_numbers = #tpu.dot_dimension_numbers<[1], [0], [0], [1], [0, 0, 1, 1], [], []>} : vector<8x32xbf16>, vector<32x32xbf16>, vector<8x32xf32> -> vector<8x32xf32>
    %c1_16 = arith.constant 1 : index
    %c0_17 = arith.constant 0 : index
    %c0_18 = arith.constant 0 : index
    %31 = vector.load %arg3[%c1_16, %c0_17, %c0_18] : memref<3x32x32xbf16, #tpu.memory_space<vmem>>, vector<1x32x32xbf16>
    %32 = vector.shape_cast %31 : vector<1x32x32xbf16> to vector<32x32xbf16>
    %cst_19 = arith.constant dense<0.000000e+00> : vector<8x32xf32>
    %33 = tpu.matmul %14, %32, %cst_19 {dimension_numbers = #tpu.dot_dimension_numbers<[1], [0], [0], [1], [0, 0, 1, 1], [], []>} : vector<8x32xbf16>, vector<32x32xbf16>, vector<8x32xf32> -> vector<8x32xf32>
    %34 = arith.addf %30, %33 : vector<8x32xf32>
    %c2_20 = arith.constant 2 : index
    %c0_21 = arith.constant 0 : index
    %c0_22 = arith.constant 0 : index
    %35 = vector.load %arg3[%c2_20, %c0_21, %c0_22] : memref<3x32x32xbf16, #tpu.memory_space<vmem>>, vector<1x32x32xbf16>
    %36 = vector.shape_cast %35 : vector<1x32x32xbf16> to vector<32x32xbf16>
    %cst_23 = arith.constant dense<0.000000e+00> : vector<8x32xf32>
    %37 = tpu.matmul %27, %36, %cst_23 {dimension_numbers = #tpu.dot_dimension_numbers<[1], [0], [0], [1], [0, 0, 1, 1], [], []>} : vector<8x32xbf16>, vector<32x32xbf16>, vector<8x32xf32> -> vector<8x32xf32>
    %38 = arith.addf %34, %37 : vector<8x32xf32>
    %39 = vector.broadcast %0 : vector<1x32xf32> to vector<8x32xf32>
    %40 = arith.addf %38, %39 : vector<8x32xf32>
    %cst_24 = arith.constant 0.000000e+00 : f32
    %41 = vector.broadcast %cst_24 : f32 to vector<8x32xf32>
    %42 = arith.maximumf %40, %41 : vector<8x32xf32>
    %cst_25 = arith.constant dense<0.000000e+00> : vector<8xf32>
    %43 = vector.multi_reduction <add>, %42, %cst_25 [1] : vector<8x32xf32> to vector<8xf32>
    %44 = vector.shape_cast %43 : vector<8xf32> to vector<8x1xf32>
    %cst_26 = arith.constant 3.125000e-02 : f32
    %45 = vector.broadcast %cst_26 : f32 to vector<8x1xf32>
    %46 = arith.mulf %44, %45 : vector<8x1xf32>
    %47 = vector.broadcast %46 : vector<8x1xf32> to vector<8x32xf32>
    %48 = arith.subf %42, %47 : vector<8x32xf32>
    %49 = arith.mulf %48, %48 : vector<8x32xf32>
    %cst_27 = arith.constant dense<0.000000e+00> : vector<8xf32>
    %50 = vector.multi_reduction <add>, %49, %cst_27 [1] : vector<8x32xf32> to vector<8xf32>
    %51 = vector.shape_cast %50 : vector<8xf32> to vector<8x1xf32>
    %cst_28 = arith.constant 3.125000e-02 : f32
    %52 = vector.broadcast %cst_28 : f32 to vector<8x1xf32>
    %53 = arith.mulf %51, %52 : vector<8x1xf32>
    %cst_29 = arith.constant 9.99999974E-6 : f32
    %54 = vector.broadcast %cst_29 : f32 to vector<8x1xf32>
    %55 = arith.addf %53, %54 : vector<8x1xf32>
    %56 = math.rsqrt %55 : vector<8x1xf32>
    %57 = vector.broadcast %56 : vector<8x1xf32> to vector<8x32xf32>
    %58 = arith.mulf %48, %57 : vector<8x32xf32>
    %59 = vector.broadcast %1 : vector<1x32xf32> to vector<8x32xf32>
    %60 = arith.mulf %58, %59 : vector<8x32xf32>
    %61 = vector.broadcast %2 : vector<1x32xf32> to vector<8x32xf32>
    %62 = arith.addf %60, %61 : vector<8x32xf32>
    %c1_i32_30 = arith.constant 1 : i32
    %63 = tpu.dynamic_rotate %62 by %c1_i32_30 dim 0 : vector<8x32xf32>, i32 -> vector<8x32xf32>
    %c7_i32_31 = arith.constant 7 : i32
    %64 = tpu.dynamic_rotate %62 by %c7_i32_31 dim 0 : vector<8x32xf32>, i32 -> vector<8x32xf32>
    %cst_32 = arith.constant 0.000000e+00 : f32
    %65 = vector.shape_cast %11 : vector<8x1xi1> to vector<8x1xi1>
    %66 = vector.broadcast %65 : vector<8x1xi1> to vector<8x32xi1>
    %67 = vector.broadcast %cst_32 : f32 to vector<8x32xf32>
    %68 = arith.select %66, %67, %63 : vector<8x32xi1>, vector<8x32xf32>
    %cst_33 = arith.constant 0.000000e+00 : f32
    %69 = vector.shape_cast %13 : vector<8x1xi1> to vector<8x1xi1>
    %70 = vector.broadcast %69 : vector<8x1xi1> to vector<8x32xi1>
    %71 = vector.broadcast %cst_33 : f32 to vector<8x32xf32>
    %72 = arith.select %70, %71, %64 : vector<8x32xi1>, vector<8x32xf32>
    %73 = arith.truncf %68 : vector<8x32xf32> to vector<8x32xbf16>
    %74 = arith.truncf %72 : vector<8x32xf32> to vector<8x32xbf16>
    %75 = arith.truncf %62 : vector<8x32xf32> to vector<8x32xbf16>
    %c0_34 = arith.constant 0 : index
    %c0_35 = arith.constant 0 : index
    %c0_36 = arith.constant 0 : index
    %76 = vector.load %arg4[%c0_34, %c0_35, %c0_36] : memref<3x32x32xbf16, #tpu.memory_space<vmem>>, vector<1x32x32xbf16>
    %77 = vector.shape_cast %76 : vector<1x32x32xbf16> to vector<32x32xbf16>
    %cst_37 = arith.constant dense<0.000000e+00> : vector<8x32xf32>
    %78 = tpu.matmul %73, %77, %cst_37 {dimension_numbers = #tpu.dot_dimension_numbers<[1], [0], [0], [1], [0, 0, 1, 1], [], []>} : vector<8x32xbf16>, vector<32x32xbf16>, vector<8x32xf32> -> vector<8x32xf32>
    %c1_38 = arith.constant 1 : index
    %c0_39 = arith.constant 0 : index
    %c0_40 = arith.constant 0 : index
    %79 = vector.load %arg4[%c1_38, %c0_39, %c0_40] : memref<3x32x32xbf16, #tpu.memory_space<vmem>>, vector<1x32x32xbf16>
    %80 = vector.shape_cast %79 : vector<1x32x32xbf16> to vector<32x32xbf16>
    %cst_41 = arith.constant dense<0.000000e+00> : vector<8x32xf32>
    %81 = tpu.matmul %75, %80, %cst_41 {dimension_numbers = #tpu.dot_dimension_numbers<[1], [0], [0], [1], [0, 0, 1, 1], [], []>} : vector<8x32xbf16>, vector<32x32xbf16>, vector<8x32xf32> -> vector<8x32xf32>
    %82 = arith.addf %78, %81 : vector<8x32xf32>
    %c2_42 = arith.constant 2 : index
    %c0_43 = arith.constant 0 : index
    %c0_44 = arith.constant 0 : index
    %83 = vector.load %arg4[%c2_42, %c0_43, %c0_44] : memref<3x32x32xbf16, #tpu.memory_space<vmem>>, vector<1x32x32xbf16>
    %84 = vector.shape_cast %83 : vector<1x32x32xbf16> to vector<32x32xbf16>
    %cst_45 = arith.constant dense<0.000000e+00> : vector<8x32xf32>
    %85 = tpu.matmul %74, %84, %cst_45 {dimension_numbers = #tpu.dot_dimension_numbers<[1], [0], [0], [1], [0, 0, 1, 1], [], []>} : vector<8x32xbf16>, vector<32x32xbf16>, vector<8x32xf32> -> vector<8x32xf32>
    %86 = arith.addf %82, %85 : vector<8x32xf32>
    %87 = vector.broadcast %3 : vector<1x32xf32> to vector<8x32xf32>
    %88 = arith.addf %86, %87 : vector<8x32xf32>
    %cst_46 = arith.constant 0.000000e+00 : f32
    %89 = vector.broadcast %cst_46 : f32 to vector<8x32xf32>
    %90 = arith.maximumf %88, %89 : vector<8x32xf32>
    %cst_47 = arith.constant dense<0.000000e+00> : vector<8xf32>
    %91 = vector.multi_reduction <add>, %90, %cst_47 [1] : vector<8x32xf32> to vector<8xf32>
    %92 = vector.shape_cast %91 : vector<8xf32> to vector<8x1xf32>
    %cst_48 = arith.constant 3.125000e-02 : f32
    %93 = vector.broadcast %cst_48 : f32 to vector<8x1xf32>
    %94 = arith.mulf %92, %93 : vector<8x1xf32>
    %95 = vector.broadcast %94 : vector<8x1xf32> to vector<8x32xf32>
    %96 = arith.subf %90, %95 : vector<8x32xf32>
    %97 = arith.mulf %96, %96 : vector<8x32xf32>
    %cst_49 = arith.constant dense<0.000000e+00> : vector<8xf32>
    %98 = vector.multi_reduction <add>, %97, %cst_49 [1] : vector<8x32xf32> to vector<8xf32>
    %99 = vector.shape_cast %98 : vector<8xf32> to vector<8x1xf32>
    %cst_50 = arith.constant 3.125000e-02 : f32
    %100 = vector.broadcast %cst_50 : f32 to vector<8x1xf32>
    %101 = arith.mulf %99, %100 : vector<8x1xf32>
    %cst_51 = arith.constant 9.99999974E-6 : f32
    %102 = vector.broadcast %cst_51 : f32 to vector<8x1xf32>
    %103 = arith.addf %101, %102 : vector<8x1xf32>
    %104 = math.rsqrt %103 : vector<8x1xf32>
    %105 = vector.broadcast %104 : vector<8x1xf32> to vector<8x32xf32>
    %106 = arith.mulf %96, %105 : vector<8x32xf32>
    %107 = vector.broadcast %4 : vector<1x32xf32> to vector<8x32xf32>
    %108 = arith.mulf %106, %107 : vector<8x32xf32>
    %109 = vector.broadcast %5 : vector<1x32xf32> to vector<8x32xf32>
    %110 = arith.addf %108, %109 : vector<8x32xf32>
    %111 = arith.truncf %6 : vector<1x32xf32> to vector<1x32xbf16>
    %112 = arith.truncf %110 : vector<8x32xf32> to vector<8x32xbf16>
    %cst_52 = arith.constant dense<0.000000e+00> : vector<1x8xf32>
    %113 = tpu.matmul %111, %112, %cst_52 {dimension_numbers = #tpu.dot_dimension_numbers<[1], [1], [0], [0], [0, 0, 1, 0], [], []>} : vector<1x32xbf16>, vector<8x32xbf16>, vector<1x8xf32> -> vector<1x8xf32>
    %114 = vector.broadcast %7 : vector<1x1xf32> to vector<1x8xf32>
    %115 = arith.addf %113, %114 : vector<1x8xf32>
    %c0_53 = arith.constant 0 : index
    %c0_54 = arith.constant 0 : index
    %c0_55 = arith.constant 0 : index
    %116 = vector.load %arg2[%c0_53, %c0_54, %c0_55] : memref<1x1x8xi32, #tpu.memory_space<vmem>>, vector<1x1x8xi32>
    %117 = vector.shape_cast %116 : vector<1x1x8xi32> to vector<1x8xi32>
    %c0_i32_56 = arith.constant 0 : i32
    %118 = vector.broadcast %c0_i32_56 : i32 to vector<1x8xi32>
    %119 = arith.cmpi ne, %117, %118 : vector<1x8xi32>
    %cst_57 = arith.constant 0.000000e+00 : f32
    %120 = vector.broadcast %cst_57 : f32 to vector<1x8xf32>
    %121 = arith.select %119, %115, %120 : vector<1x8xi1>, vector<1x8xf32>
    %c0_58 = arith.constant 0 : index
    %c0_59 = arith.constant 0 : index
    %c0_60 = arith.constant 0 : index
    %122 = vector.load %arg6[%c0_58, %c0_59, %c0_60] : memref<1x1x8xf32, #tpu.memory_space<vmem>>, vector<1x1x8xf32>
    %123 = vector.shape_cast %122 : vector<1x1x8xf32> to vector<1x8xf32>
    %124 = vector.shape_cast %121 : vector<1x8xf32> to vector<1x1x8xf32>
    tpu.vector_store %arg6[%c0_58, %c0_59, %c0_60], %124 {strides = array<i32>} : memref<1x1x8xf32, #tpu.memory_space<vmem>>, vector<1x1x8xf32>,
    return
  }
  func.func @transform_0(%arg0: i32) -> (i32, i32) {
    %c0_i32 = arith.constant 0 : i32
    %c0_i32_0 = arith.constant 0 : i32
    return %arg0, %c0_i32 : i32, i32
  }
  func.func @transform_1(%arg0: i32) -> (i32, i32, i32) {
    %c0_i32 = arith.constant 0 : i32
    %c0_i32_0 = arith.constant 0 : i32
    %c0_i32_1 = arith.constant 0 : i32
    return %arg0, %c0_i32, %c0_i32_0 : i32, i32, i32
  }
  func.func @transform_2(%arg0: i32) -> (i32, i32, i32) {
    %c0_i32 = arith.constant 0 : i32
    %c0_i32_0 = arith.constant 0 : i32
    %c0_i32_1 = arith.constant 0 : i32
    %c0_i32_2 = arith.constant 0 : i32
    return %c0_i32, %c0_i32_0, %c0_i32_1 : i32, i32, i32
  }
  func.func @transform_3(%arg0: i32) -> (i32, i32, i32) {
    %c0_i32 = arith.constant 0 : i32
    %c0_i32_0 = arith.constant 0 : i32
    %c0_i32_1 = arith.constant 0 : i32
    %c0_i32_2 = arith.constant 0 : i32
    return %c0_i32, %c0_i32_0, %c0_i32_1 : i32, i32, i32
  }
  func.func @transform_4(%arg0: i32) -> (i32, i32) {
    %c0_i32 = arith.constant 0 : i32
    %c0_i32_0 = arith.constant 0 : i32
    %c0_i32_1 = arith.constant 0 : i32
    return %c0_i32, %c0_i32_0 : i32, i32
  }
  func.func @transform_5(%arg0: i32) -> (i32, i32, i32) {
    %c0_i32 = arith.constant 0 : i32
    %c0_i32_0 = arith.constant 0 : i32
    %c0_i32_1 = arith.constant 0 : i32
    return %arg0, %c0_i32, %c0_i32_0 : i32, i32, i32
  }
}

</mosaic_0001>

<bundles_post_ra>
// kernel: tpu_custom_call.1
= control target key start
LH: loop header
LB: loop body
LE: loop exit
PB: predicated region body
PF: predicated region fallthrough
CT: control target
= control target key end

     0   :  { %10 = vsyncpa [#allocation3], 0  ;;  %s1710_s0 = inlined_call_operand.hbm [shape: bf16[16,32], index: 0, kind: input, shape index: {}]   ;;  %s1711_s1 = inlined_call_operand.hbm [shape: s32[2,1,8], index: 1, kind: input, shape index: {}]   ;;  %s1712_s2 = inlined_call_operand.hbm [shape: bf16[3,32,32], index: 2, kind: input, shape index: {}]   ;;  %s1713_s3 = inlined_call_operand.hbm [shape: bf16[3,32,32], index: 3, kind: input, shape index: {}]   ;;  %s1714_s4 = inlined_call_operand.hbm [shape: f32[8,32], index: 4, kind: input, shape index: {}]   ;;  %s1715_s5 = inlined_call_operand.hbm [shape: f32[2,1,8], index: 5, kind: output, shape index: {}]  }
   0x1   :  { %12 = vsyncpa [#allocation3 + $0x1], 0 }
   0x2   :  { %13 = vsyncpa [#allocation6], 0 }
   0x3   :  { %15 = vsyncpa [#allocation6 + $0x1], 0 }
   0x4   :  { %16 = vsyncpa [#allocation9], 0 }
   0x5   :  { %17 = vsyncpa [#allocation4], 0 }
   0x6   :  { %19 = vsyncpa [#allocation4 + $0x1], 0  ;;  %s1423_s18 = smov 0   ;;  %s1425_s19 = smov 0  }
   0x7   :  { %s1427_s20 = smov 0   ;;  %s1429_s21 = smov 0  }
   0x8 LB: > { %s1444_s22 = sadd.s32 4294967295, %s1380_s21   ;;  %s950_s23 = sadd.s32 4294967294, %s1380_s21   ;;  %s1380_s21 = sphi %s1429_s21, %s1740_s21   ;;  %s1376_s20 = sphi %s1427_s20, %s1739_s20   ;;  %s1372_s19 = sphi %s1425_s19, %s1738_s19   ;;  %s1368_s18 = sphi %s1423_s18, %s1737_s18  }
   0x9   : > { %p45_p0 = scmp.ne.s32.totalorder %s1372_s19, %s1368_s18  ;;  %p1716_p1 = scmp.eq.s32.totalorder %s1444_s22, 0 }
   0xa   : > { %p164_p3 = scmp.eq.s32.totalorder %s950_s23, 1  ;;  %p951_p5 = scmp.ge.s32.totalorder %s1380_s21, 1 }
   0xb   : > { %p1453_p4 = por %p1716_p1, %p45_p0  ;;  %p171_p7 = scmp.lt.s32.totalorder %s1380_s21, 3 }
   0xc   : > { %p1458_p6 = por %p164_p3, %p45_p0  ;;  %s1382_s27 = smov [#allocation7]  }
   0xd   : > { %s1720_s24 = scalar_select %p1453_p4, 1, 0 }
   0xe   : > { %s1721_s25 = scalar_select %p1458_p6, 1, 0 }
   0xf   : > { %p1463_p8 = pnand %p951_p5, %p171_p7  ;;  %s183_s28 = sshll.u32 %s1382_s27, 4  ;;  %s184_s28 = int_to_ptr.vmem [resolvable:$true] %s183_s28 }
  0x10   : > { %s1383_s30 = smov [#allocation8]   ;;  %s1384_s7 = smov [#allocation10]  }
  0x11   : > { %s1722_s26 = scalar_select %p1463_p8, 1, 0 }
  0x12   : > { %p1084_p9 = pneg %p1463_p8  ;;  %s196_s6 = sshll.u32 %s1383_s30, 4  ;;  %s197_s6 = int_to_ptr.vmem [resolvable:$true] %s196_s6 }
  0x13   : > { %s210_s8 = sshll.u32 %s1384_s7, 4  ;;  %s1181_s9 = scalar_lea.vmem %s184_s28, 768  ;;  %s211_s8 = int_to_ptr.vmem [resolvable:$true] %s210_s8 }
  0x14   : > { %p1472_p11 = pnand %p1084_p9, %p1716_p1  ;;  %p1182_p13 = scmp.ne.s32.totalorder %s184_s28, %s1181_s9 }
  0x15   : > { %p1189_p5 = scmp.lt.s32.totalorder %s184_s28, %s184_s28  ;;  %p1190_p7 = scmp.lt.s32.totalorder %s1181_s9, %s1181_s9 }
  0x16   : > { %p1172_p12 = pneg %p1472_p11 }
  0x17   : > { %p1191_p9 = por %p1190_p7, %p1189_p5 }
  0x18   : > { %p1184_p0 = pnand %p1182_p13, %p1172_p12 }
  0x1a   : > { %p1185_p3 = pneg %p1184_p0 }
  0x1c   : > { %p1192_p10 = pnand %p1191_p9, %p1185_p3 }
  0x1e   : > { %1195 = shalt.err (!%p1192_p10)
}
  0x1f   : > { %s1385_s10 = smov 64   ;;  %s1386_s11 = smov 4  }
  0x20   : > { %1087 = dma.hbm_to_vmem [thread:$0]  (!%p1472_p11), %s1712_s2, 768, %s184_s28, [#allocation6], %s1385_s10, %s1385_s10, %s1386_s11  }
  0x21   : > { %s1207_s14 = scalar_lea.vmem %s197_s6, 768  ;;  %p1215_p2 = scmp.lt.s32.totalorder %s197_s6, %s197_s6 }
  0x22   : > { %p1208_p1 = scmp.ne.s32.totalorder %s197_s6, %s1207_s14  ;;  %p1216_p6 = scmp.lt.s32.totalorder %s1207_s14, %s1207_s14 }
  0x24   : > { %p1210_p13 = pnand %p1208_p1, %p1172_p12  ;;  %p1217_p5 = por %p1216_p6, %p1215_p2 }
  0x26   : > { %p1211_p0 = pneg %p1210_p13 }
  0x28   : > { %p1218_p3 = pnand %p1217_p5, %p1211_p0 }
  0x2a   : > { %1221 = shalt.err (!%p1218_p3)
}
  0x2b   : > { %1090 = dma.hbm_to_vmem [thread:$0]  (!%p1472_p11), %s1713_s3, 768, %s197_s6, [#allocation9], %s1385_s10, %s1385_s10, %s1386_s11  }
  0x2c   : > { %s1233_s17 = scalar_lea.vmem %s211_s8, 128  ;;  %p1241_p9 = scmp.lt.s32.totalorder %s211_s8, %s211_s8 }
  0x2d   : > { %p1234_p10 = scmp.ne.s32.totalorder %s211_s8, %s1233_s17  ;;  %p1242_p13 = scmp.lt.s32.totalorder %s1233_s17, %s1233_s17 }
  0x2f   : > { %p1236_p7 = pnand %p1234_p10, %p1172_p12  ;;  %p1243_p4 = por %p1242_p13, %p1241_p9 }
  0x31   : > { %p1237_p1 = pneg %p1236_p7 }
  0x33   : > { %p1244_p2 = pnand %p1243_p4, %p1237_p1 }
  0x35   : > { %1247 = shalt.err (!%p1244_p2)
}
  0x36   : > { %1093 = dma.hbm_to_vmem [thread:$0]  (!%p1472_p11), %s1714_s4, 128, %s211_s8, [#allocation9]  }
  0x37   : > { %s1503_s28 = sadd.s32 1, %s1380_s21   ;;  %s32_s29 = sadd.s32 1, %s1376_s20 }
  0x38   : > { %s29_s30 = ssub.s32 %s1380_s21, %s1503_s28  ;;  %p39_p6 = scmp.ne.s32.totalorder %s1376_s20, %s1372_s19 }
  0x39   : > { %p30_p4 = scmp.eq.s32.totalorder %s29_s30, 0  ;;  %p40_p12 = scmp.eq.s32.totalorder %s1380_s21, 0 }
  0x3a   : > { %p1108_p0 = scmp.lt.s32.totalorder %s1380_s21, 2  ;;  %p1724_p3 = scmp.eq.s32.totalorder %s1444_s22, 1 }
  0x3b   : > { %s1513_s6 = scalar_select %p30_p4, %s1376_s20, %s32_s29  }
  0x3c   : > { %p41_p5 = por %p40_p12, %p39_p6  ;;  %p1517_p10 = por %p1724_p3, %p39_p6 }
  0x3d   : > { %s1522_s9 = sand.u32 1, %s1376_s20   ;;  %s957_s8 = sshll.u32 %s1380_s21, 6 }
  0x3e   : > { %s1725_s7 = scalar_select %p1517_p10, 1, 0 }
  0x3f   : > { %s956_s10 = sshll.u32 %s1522_s9, 2  ;;  %s1529_s13 = scalar_lea.hbm %s1710_s0, %s957_s8 }
  0x40   : > { %s225_s14 = scalar_lea.vmem [#allocation2], %s956_s10  ;;  %p1531_p11 = pnand %p1108_p0, %p41_p5 }
  0x41   : > { %s232_s15 = sshll.u32 %s225_s14, 4  ;;  %s222_s23 = scalar_lea.sflag [#allocation3], %s1522_s9  ;;  %s233_s15 = int_to_ptr.vmem [resolvable:$true] %s232_s15 }
  0x42   : > { %s1248_s27 = scalar_lea.hbm %s1529_s13, 64  ;;  %p1250_p1 = pneg %p1531_p11 }
  0x43   : > { %p1249_p7 = scmp.ne.s32.totalorder %s1529_s13, %s1248_s27  ;;  %s1253_s8 = scalar_lea.hbm %s1710_s0, 128 }
  0x44   : > { %p1254_p2 = scmp.lt.s32.totalorder %s1529_s13, %s1710_s0  ;;  %p1255_p4 = scmp.lt.s32.totalorder %s1253_s8, %s1248_s27 }
  0x45   : > { %p1251_p9 = pnand %p1250_p1, %p1249_p7 }
  0x46   : > { %p1256_p6 = por %p1255_p4, %p1254_p2 }
  0x47   : > { %p1252_p13 = pneg %p1251_p9 }
  0x49   : > { %p1257_p12 = pnand %p1256_p6, %p1252_p13 }
  0x4b   : > { %1260 = shalt.err (!%p1257_p12)
}
  0x4c   : > { %s1261_s12 = scalar_lea.vmem %s233_s15, 64  ;;  %s1387_s14 = smov [#allocation2]  }
  0x4d   : > { %p1262_p0 = scmp.ne.s32.totalorder %s233_s15, %s1261_s12  ;;  %s1266_s17 = sshll.u32 %s1387_s14, 4  ;;  %s1267_s17 = int_to_ptr.vmem [resolvable:$false] %s1266_s17 }
  0x4e   : > { %s1268_s30 = scalar_lea.vmem %s1267_s17, 128  ;;  %p1269_p7 = scmp.lt.s32.totalorder %s233_s15, %s1267_s17 }
  0x4f   : > { %p1264_p5 = pnand %p1262_p0, %p1250_p1  ;;  %p1270_p9 = scmp.lt.s32.totalorder %s1268_s30, %s1261_s12 }
  0x51   : > { %p1265_p3 = pneg %p1264_p5  ;;  %p1271_p10 = por %p1270_p9, %p1269_p7 }
  0x53   : > { %p1272_p8 = pnand %p1271_p10, %p1265_p3 }
  0x55   : > { %1275 = shalt.err (!%p1272_p8)
}
  0x56   : > { %1097 = dma.hbm_to_vmem [thread:$0]  (!%p1531_p11), %s1529_s13, 64, %s233_s15, %s222_s23  }
  0x57   : > { %s958_s27 = sshll.u32 %s1380_s21, 4  ;;  %s242_s17 = scalar_lea.vmem [#allocation5], %s1522_s9 }
  0x58   : > { %s1561_s10 = scalar_lea.hbm %s1711_s1, %s958_s27  ;;  %s249_s11 = sshll.u32 %s242_s17, 4  ;;  %s250_s11 = int_to_ptr.vmem [resolvable:$true] %s249_s11 }
  0x59   : > { %s1727_s12 = sand.u32 1, %s1380_s21   ;;  %s1276_s30 = scalar_lea.hbm %s1561_s10, 16 }
  0x5a   : > { %s240_s14 = scalar_lea.sflag [#allocation6], %s1727_s12  ;;  %p1277_p8 = scmp.ne.s32.totalorder %s1561_s10, %s1276_s30 }
  0x5b   : > { %s1281_s23 = scalar_lea.hbm %s1711_s1, 32  ;;  %p1282_p2 = scmp.lt.s32.totalorder %s1561_s10, %s1711_s1 }
  0x5c   : > { %p1279_p10 = pnand %p1277_p8, %p1250_p1  ;;  %p1283_p4 = scmp.lt.s32.totalorder %s1281_s23, %s1276_s30 }
  0x5e   : > { %p1280_p13 = pneg %p1279_p10  ;;  %p1284_p6 = por %p1283_p4, %p1282_p2 }
  0x60   : > { %p1285_p12 = pnand %p1284_p6, %p1280_p13 }
  0x62   : > { %1288 = shalt.err (!%p1285_p12)
}
  0x63   : > { %s1289_s9 = scalar_lea.vmem %s250_s11, 16  ;;  %s1388_s8 = smov [#allocation5]  }
  0x64   : > { %p1290_p0 = scmp.ne.s32.totalorder %s250_s11, %s1289_s9  ;;  %s1294_s17 = sshll.u32 %s1388_s8, 4  ;;  %s1295_s17 = int_to_ptr.vmem [resolvable:$false] %s1294_s17 }
  0x65   : > { %s1296_s12 = scalar_lea.vmem %s1295_s17, 32  ;;  %p1297_p7 = scmp.lt.s32.totalorder %s250_s11, %s1295_s17 }
  0x66   : > { %p1292_p5 = pnand %p1290_p0, %p1250_p1  ;;  %p1298_p9 = scmp.lt.s32.totalorder %s1296_s12, %s1289_s9 }
  0x68   : > { %p1293_p3 = pneg %p1292_p5  ;;  %p1299_p8 = por %p1298_p9, %p1297_p7 }
  0x6a   : > { %p1300_p10 = pnand %p1299_p8, %p1293_p3 }
  0x6c   : > { %1303 = shalt.err (!%p1300_p10)
}
  0x6d   : > { %1100 = dma.hbm_to_vmem [thread:$0]  (!%p1531_p11), %s1561_s10, 16, %s250_s11, %s240_s14  }
  0x6e   : > { %p1728_p13 = scmp.ne.s32.totalorder %s1722_s26, 0 }
  0x6f   : > { %s1587_s30 = sand.u32 (!%p1728_p13), 1, %s1372_s19   ;;  %p1729_p1 = scmp.ne.s32.totalorder (!%p1728_p13), %s1720_s24, 0 }
  0x70   : > { %258 = sbr.rel (%p1728_p13) target bundleno = 1389 (0x56d), region = 40  ;;  %s960_s13 = sshll.u32 (!%p1728_p13), %s1587_s30, 2 }
  0x71   : > { %s261_s15 = scalar_lea.sflag (!%p1728_p13), [#allocation3], %s1587_s30  ;;  %s264_s23 = scalar_lea.vmem (!%p1728_p13), [#allocation2], %s960_s13 }
  0x75   : > { %1347 = dma.done.wait (%p1729_p1), %s261_s15, 64  }
  0x76   : > { %1349 = vsyncadd (%p1729_p1), %s261_s15, 4294967232  ;;  %s269_s16 = sand.u32 1, %s1444_s22   ;;  %s272_s10 = scalar_lea.vmem [#allocation5], %s1587_s30 }
  0x77   : > { %s270_s26 = scalar_lea.sflag [#allocation6], %s269_s16 }
  0x78   : > { %1351 = dma.done.wait (%p1729_p1), %s270_s26, 16  }
  0x79   : > { %1353 = vsyncadd (%p1729_p1), %s270_s26, 4294967280  ;;  %p1730_p11 = scmp.eq.s32.totalorder %s1444_s22, 0 }
  0x7b   : > { %1355 = dma.done.wait (%p1730_p11), [#allocation6], 768   ;;  %p1731_p2 = pmov %p1730_p11 }
  0x7d   : > { %1357 = vsyncadd (%p1731_p2), [#allocation6], 4294966528  ;;  %p1732_p4 = pmov %p1731_p2 }
  0x7e   : > { %p1733_p6 = pmov %p1731_p2 }
  0x7f   : > { %1359 = dma.done.wait (%p1732_p4), [#allocation9], 896  }
  0x80   : > { %1361 = vsyncadd (%p1733_p6), [#allocation9], 4294966400  ;;  %v1389_v0 = vmov 0.0   ;;  %vm1390_vm0 = vmmov 0   ;;  %v323_v1 = vlaneseq  ;;  %v1154_v2 = vld [vmem:[#allocation7 + $0x18] sm:$0xff]   ;;  %v1155_v3 = vld [vmem:[#allocation7 + $0x8] sm:$0xff]  }
  0x81   : > { %1012 = vmatprep.subr.bf16.mxu0 %v1389_v0  ;;  %1020 = vmatprep.subr.bf16.mxu1 %v1389_v0  ;;  %v1156_v4 = vld [vmem:[#allocation7 + $0x10] sm:$0xff]   ;;  %v1157_v6 = vld [vmem:[#allocation7] sm:$0xff]   ;;  %vm360_vm2 = vcmask 261120   ;;  %v1158_v9 = vld [vmem:[#allocation7 + $0x28] sm:$0xff]   ;;  %s989_s24 = sshll.u32 %s1444_s22, 4  ;;  %s313_s11 = scalar_lea.vmem [#allocation11], %s1587_s30 }
  0x82   : > { %1016 = vmatprep.mubr.msk.bf16.mxu0 %vm1390_vm0, %v1389_v0  ;;  %1024 = vmatprep.mubr.msk.bf16.mxu1 %vm1390_vm0, %v1389_v0  ;;  %v1615_v5 = vshrl.u32 %v323_v1, 7  ;;  %v327_v7 = vld [vmem:[%s264_s23] sm:$0xf]  ;;  %v1159_v12 = vld [vmem:[#allocation7 + $0x20] sm:$0xff]   ;;  %v1160_v40 = vld [vmem:[#allocation8 + $0x18] sm:$0xff]   ;;  %s836_s14 = sshll.u32 %s313_s11, 4  ;;  %s1667_s9 = scalar_lea.hbm %s1715_s5, %s989_s24  ;;  %s1669_s14 = int_to_ptr.vmem [resolvable:$true] %s836_s14 }
  0x83   : > { %1013 = vmatpush3.bf16.msra.mxu0 %v1154_v2  ;;  %1021 = vmatpush3.bf16.msra.mxu1 %v1155_v3  ;;  %v328_v8 = vunpack.c.l.bf16 %v327_v7  ;;  %v973_v26 = vld [vmem:[#allocation10] ss:$0 sm:$0xff]  ;;  %v1161_v41 = vld [vmem:[#allocation8 + $0x8] sm:$0xff]   ;;  %v1163_v43 = vld [vmem:[#allocation8] sm:$0xff]   ;;  %vm821_vm5 = vcmask 57344   ;;  %s824_s22 = scalar_lea.sflag [#allocation4], %s1587_s30 }
  0x84   : > { %1014 = vmatprep.subr.bf16.mxu0 %v1389_v0  ;;  %1022 = vmatprep.subr.bf16.mxu1 %v1389_v0  ;;  %vm326_vm1 = vcmp.eq.s32.totalorder %v1615_v5, 7  ;;  %vm325_vm3 = vcmp.eq.s32.totalorder %v1615_v5, 0  ;;  %v1162_v42 = vld [vmem:[#allocation8 + $0x10] sm:$0xff]   ;;  %v1164_v53 = vld [vmem:[#allocation8 + $0x28] sm:$0xff]   ;;  %v1165_v59 = vld [vmem:[#allocation8 + $0x20] sm:$0xff]   ;;  %s1304_s8 = scalar_lea.vmem %s1669_s14, 16 }
  0x85   : > { %v329_v10 = vrot.slane %v328_v8, 7  ;;  %v330_v11 = vrot.slane %v328_v8, 1  ;;  %v974_v48 = vld [vmem:[#allocation10 + $0x1] ss:$0 sm:$0xff]  ;;  %v975_v50 = vld [vmem:[#allocation10 + $0x2] ss:$0 sm:$0xff]  ;;  %p1305_p12 = scmp.ne.s32.totalorder %s1669_s14, %s1304_s8 }
  0x86   : > { %p1734_p0 = scmp.ne.s32.totalorder %s1725_s7, 0  ;;  %s1392_s17 = smov [#allocation11]  }
  0x87   : > { %1015 = vmatpush3.bf16.msra.mxu0 %v1156_v4  ;;  %1023 = vmatpush3.bf16.msra.mxu1 %v1157_v6  ;;  %v336_v13 = vsel %vm326_vm1, 0.0, %v330_v11  ;;  %v333_v14 = vsel %vm325_vm3, 0.0, %v329_v10  ;;  %s1308_s12 = sshll.u32 %s1392_s17, 4  ;;  %s1309_s12 = int_to_ptr.vmem [resolvable:$false] %s1308_s12 }
  0x88   : > { %1028 = vmatprep.subr.bf16.mxu0 %v1389_v0  ;;  %1036 = vmatprep.subr.bf16.mxu1 %v1389_v0  ;;  %v337_v15 = vpack.c.bf16 %v333_v14, %v333_v14  ;;  %v338_v16 = vpack.c.bf16 %v336_v13, %v336_v13  ;;  %p1306_p5 = pnand %p1305_p12, %p1734_p0  ;;  %s1310_s13 = scalar_lea.vmem %s1309_s12, 32 }
  0x89   : > { %p1311_p7 = scmp.lt.s32.totalorder %s1669_s14, %s1309_s12  ;;  %p1312_p9 = scmp.lt.s32.totalorder %s1310_s13, %s1304_s8 }
  0x8a   : > { %1017 = vmatmul.mubr.msk.bf16.vlgmr.msra.gmra.mxu0 %vm360_vm2, %v327_v7  ;;  %1025 = vmatmul.mubr.msk.bf16.vlgmr.msra.gmra.mxu1 %vm360_vm2, %v337_v15  ;;  %p1307_p3 = pneg %p1306_p5 }
  0x8b   : > { %1029 = vmatpush3.bf16.msra.mxu0 %v1158_v9  ;;  %1032 = vmatprep.mubr.msk.bf16.mxu0 %vm1390_vm0, %v1389_v0  ;;  %v985_v9 = vld [vmem:[#allocation10 + $0x3] ss:$0 sm:$0xff]  ;;  %p1313_p8 = por %p1312_p9, %p1311_p7 }
  0x8c   : > { %1030 = vmatprep.subr.bf16.mxu0 %v1389_v0  ;;  %1040 = vmatprep.mubr.msk.bf16.mxu1 %vm1390_vm0, %v1389_v0 }
  0x8d   : > { %1037 = vmatpush3.bf16.msra.mxu1 %v1160_v40  ;;  %p1314_p10 = pnand %p1313_p8, %p1307_p3 }
  0x8e   : > { %1038 = vmatprep.subr.bf16.mxu1 %v1389_v0 }
  0x8f   : > { %1031 = vmatpush3.bf16.msra.mxu0 %v1159_v12 }
  0x90   : > { %1044 = vmatprep.subr.bf16.mxu0 %v1389_v0 }
  0x91   : > { %1039 = vmatpush3.bf16.msra.mxu1 %v1162_v42 }
  0x92   : > { %1033 = vmatmul.mubr.msk.bf16.vlgmr.msra.gmra.mxu0 %vm360_vm2, %v338_v16  ;;  %1052 = vmatprep.subr.bf16.mxu1 %v1389_v0 }
  0x93   : > { %1048 = vmatprep.mubr.msk.bf16.mxu0 %vm1390_vm0, %v1389_v0  ;;  %1045 = vmatpush3.bf16.msra.mxu0 %v1161_v41 }
  0x94   : > { %1046 = vmatprep.subr.bf16.mxu0 %v1389_v0 }
  0x97   : > { %1047 = vmatpush3.bf16.msra.mxu0 %v1163_v43 }
  0x98   : > { %1060 = vmatprep.subr.bf16.mxu0 %v1389_v0 }
 0x14a   : > { %v398_v17 = vpop.f32.mrf.mxu0  ;;  %v453_v19 = vpop.f32.mrf.mxu1 }
 0x14b   : > { %v454_v23 = vadd.f32 %v453_v19, %v398_v17 }
 0x14c   : > { %v1018_v18 = vpop.f32.mrf.mxu0  ;;  %v1026_v21 = vpop.f32.mrf.mxu1 }
 0x14d   : > { %v322_v21 = vld [vmem:[#allocation10 + $0x7] sm:$0x1] }
 0x14e   : > { %v401_v20 = vpop.f32.mrf.mxu0  ;;  %v456_v24 = vpop.f32.mrf.mxu1 }
 0x150   : > { %v1019_v22 = vpop.f32.mrf.mxu0  ;;  %v1027_v27 = vpop.f32.mrf.mxu1 }
 0x151   : > { %v1391_v22 = vmov 0   ;;  %v986_v27 = vld [vmem:[#allocation10 + $0x4] ss:$0 sm:$0xff] }
 0x152   : > { %v513_v25 = vpop.f32.mrf.mxu0  ;;  %1153 = vset.pattern.permute.xlu0 %v1391_v22 }
 0x153   : > { %v519_v28 = vadd.f32 %v513_v25, %v454_v23 }
 0x154   : > { %v1034_v29 = vpop.f32.mrf.mxu0 }
 0x155   : > { %v524_v30 = vadd.f32 %v973_v26, %v519_v28  ;;  %v987_v29 = vld [vmem:[#allocation10 + $0x5] ss:$0 sm:$0xff] }
 0x156   : > { %v516_v31 = vpop.f32.mrf.mxu0 }
 0x157   : > { %v525_v32 = vmax.f32 %v524_v30, 0.0 }
 0x158   : > { %v1035_v33 = vpop.f32.mrf.mxu0 }
 0x159   : > { %v526_v34 = vsel %vm360_vm2, %v525_v32, 0.0 }
 0x15a   : > { %527 = vadd.xlane.f32.xlu0 %v526_v34  ;;  %v321_v34 = vld [vmem:[#allocation10 + $0x6] sm:$0x1] }
 0x1e3   : > { %v528_v35 = vpop.xlane.xlu0 %527 }
 0x1e4   : > { %v529_v36 = vmul.f32 0.03125, %v528_v35  ;;  %v765_v35 = vpack.c.bf16 %v321_v34, %v321_v34 }
 0x1e6   : > { %v530_v37 = vsub.f32 %v525_v32, %v529_v36  ;;  %v818_v36 = vld [vmem:[%s272_s10] sm:$0x1] }
 0x1e7   : > { %vm819_vm4 = vcmp.ne.s32.totalorder %v818_v36, 0 }
 0x1e8   : > { %v531_v38 = vmul.f32 %v530_v37, %v530_v37 }
 0x1ea   : > { %v532_v39 = vsel %vm360_vm2, %v531_v38, 0.0 }
 0x1eb   : > { %533 = vadd.xlane.f32.xlu0 %v532_v39 }
 0x201   : > { %769 = vperm.xlu0 %1153, %v322_v21  }
 0x274   : > { %v534_v44 = vpop.xlane.xlu0 %533 }
 0x275   : > { %v535_v45 = vmul.f32 0.03125, %v534_v44 }
 0x277   : > { %v536_v46 = vadd.f32 1e-05, %v535_v45 }
 0x279   : > { %1166 = vrsqrt.f32 %v536_v46 }
 0x286   : > { %v1167_v47 = vpop.eup %1166 }
 0x287   : > { %v538_v49 = vmul.f32 %v1167_v47, %v530_v37  ;;  %v770_v37 = vpop.permute.xlu0 %769 }
 0x289   : > { %v543_v51 = vmul.f32 %v974_v48, %v538_v49 }
 0x28b   : > { %v548_v52 = vadd.f32 %v975_v50, %v543_v51 }
 0x28d   : > { %v555_v54 = vpack.c.bf16 %v548_v52, %v548_v52  ;;  %v549_v55 = vrot.slane %v548_v52, 7  ;;  %v550_v56 = vrot.slane %v548_v52, 1 }
 0x28f   : > { %1041 = vmatmul.mubr.msk.bf16.vlgmr.msra.gmra.mxu1 %vm360_vm2, %v555_v54  ;;  %v551_v57 = vsel %vm325_vm3, 0.0, %v549_v55  ;;  %v552_v60 = vsel %vm326_vm1, 0.0, %v550_v56 }
 0x290   : > { %1053 = vmatpush3.bf16.msra.mxu1 %v1164_v53  ;;  %v553_v58 = vpack.c.bf16 %v551_v57, %v551_v57  ;;  %1056 = vmatprep.mubr.msk.bf16.mxu1 %vm1390_vm0, %v1389_v0  ;;  %v554_v61 = vpack.c.bf16 %v552_v60, %v552_v60 }
 0x291   : > { %1054 = vmatprep.subr.bf16.mxu1 %v1389_v0 }
 0x292   : > { %1049 = vmatmul.mubr.msk.bf16.vlgmr.msra.gmra.mxu0 %vm360_vm2, %v553_v58 }
 0x293   : > { %1062 = vmatprep.mubr.msk.bf16.mxu0 %vm1390_vm0, %v1389_v0 }
 0x294   : > { %1055 = vmatpush3.bf16.msra.mxu1 %v1165_v59 }
 0x297   : > { %1057 = vmatmul.mubr.msk.bf16.vlgmr.msra.gmra.mxu1 %vm360_vm2, %v554_v61 }
 0x34f   : > { %v614_v62 = vpop.f32.mrf.mxu1 }
 0x351   : > { %v1042_v63 = vpop.f32.mrf.mxu1 }
 0x352   : > { %v669_v1 = vpop.f32.mrf.mxu0 }
 0x353   : > { %v617_v2 = vpop.f32.mrf.mxu1  ;;  %v670_v6 = vadd.f32 %v669_v1, %v614_v62 }
 0x354   : > { %v1050_v3 = vpop.f32.mrf.mxu0 }
 0x355   : > { %v1043_v4 = vpop.f32.mrf.mxu1 }
 0x356   : > { %v672_v7 = vpop.f32.mrf.mxu0 }
 0x357   : > { %v729_v8 = vpop.f32.mrf.mxu1 }
 0x358   : > { %v735_v10 = vadd.f32 %v729_v8, %v670_v6  ;;  %v1051_v5 = vpop.f32.mrf.mxu0 }
 0x359   : > { %v1058_v11 = vpop.f32.mrf.mxu1 }
 0x35a   : > { %v740_v12 = vadd.f32 %v985_v9, %v735_v10 }
 0x35b   : > { %v732_v13 = vpop.f32.mrf.mxu1 }
 0x35c   : > { %v741_v0 = vmax.f32 %v740_v12, 0.0 }
 0x35d   : > { %v1059_v14 = vpop.f32.mrf.mxu1 }
 0x35e   : > { %v742_v15 = vsel %vm360_vm2, %v741_v0, 0.0 }
 0x35f   : > { %743 = vadd.xlane.f32.xlu1 %v742_v15 }
 0x3e8   : > { %v744_v16 = vpop.xlane.xlu1 %743 }
 0x3e9   : > { %v745_v17 = vmul.f32 0.03125, %v744_v16 }
 0x3eb   : > { %v746_v18 = vsub.f32 %v741_v0, %v745_v17 }
 0x3ed   : > { %v747_v19 = vmul.f32 %v746_v18, %v746_v18 }
 0x3ef   : > { %v748_v20 = vsel %vm360_vm2, %v747_v19, 0.0 }
 0x3f0   : > { %749 = vadd.xlane.f32.xlu1 %v748_v20 }
 0x479   : > { %v750_v23 = vpop.xlane.xlu1 %749 }
 0x47a   : > { %v751_v24 = vmul.f32 0.03125, %v750_v23 }
 0x47c   : > { %v752_v25 = vadd.f32 1e-05, %v751_v24 }
 0x47e   : > { %1168 = vrsqrt.f32 %v752_v25 }
 0x48b   : > { %v1169_v26 = vpop.eup %1168 }
 0x48c   : > { %v754_v28 = vmul.f32 %v1169_v26, %v746_v18 }
 0x48e   : > { %v759_v30 = vmul.f32 %v986_v27, %v754_v28 }
 0x490   : > { %v764_v31 = vadd.f32 %v987_v29, %v759_v30 }
 0x492   : > { %v766_v32 = vpack.c.bf16 %v764_v31, %v764_v31 }
 0x494   : > { %v776_v33 = vsel %vm360_vm2, %v766_v32, 0 }
 0x495   : > { %1061 = vmatpush3.bf16.xpose.msra.mxu0 %v776_v33 }
 0x49c   : > { %1063 = vmatmul.mubr.msk.bf16.vlgmr.msra.gmra.mxu0 %vm360_vm2, %v765_v35 }
 0x55c   : > { %v812_v38 = vpop.f32.mrf.mxu0 }
 0x55d   : > { %v813_v39 = vadd.f32 %v812_v38, %v770_v37 }
 0x55e   : > { %v1064_v40 = vpop.f32.mrf.mxu0 }
 0x55f   : > { %v820_v41 = vsel %vm819_vm4, %v813_v39, 0.0 }
 0x560   : > { %v815_v42 = vpop.f32.mrf.mxu0  ;;  %822 = vst.msk [vmem:[%s313_s11] sm:$0x1] %vm821_vm5, %v820_v41 }
 0x561   : > { %1317 = shalt.err (!%p1314_p10)
}
 0x562   : > { %s1318_s15 = scalar_lea.hbm %s1667_s9, 16  ;;  %s1322_s16 = scalar_lea.hbm %s1715_s5, 32 }
 0x563   : > { %p1319_p13 = scmp.ne.s32.totalorder %s1667_s9, %s1318_s15  ;;  %p1323_p2 = scmp.lt.s32.totalorder %s1667_s9, %s1715_s5 }
 0x564   : > { %p1324_p4 = scmp.lt.s32.totalorder %s1322_s16, %s1318_s15 }
 0x565   : > { %p1320_p1 = pnand %p1319_p13, %p1734_p0 }
 0x566   : > { %p1325_p6 = por %p1324_p4, %p1323_p2 }
 0x567   : > { %p1321_p11 = pneg %p1320_p1 }
 0x569   : > { %p1326_p12 = pnand %p1325_p6, %p1321_p11 }
 0x56b   : > { %1329 = shalt.err (!%p1326_p12)
}
 0x56c   : > { %1082 = dma.vmem_to_hbm [thread:$0]  (%p1734_p0), %s1669_s14, 16, %s1667_s9, %s824_s22   ;;  %v1065_v43 = vpop.f32.mrf.mxu0 }
 0x56d PF: > { %s848_s24 = sand.u32 1, %s1368_s18   ;;  %p1735_p5 = scmp.ne.s32.totalorder %s1721_s25, 0 }
 0x56e   : > { %p1736_p3 = scmp.ge.s32.totalorder %s1380_s21, 2  ;;  %s849_s11 = scalar_lea.sflag [#allocation4], %s848_s24 }
 0x570   : > { %p1102_p7 = pnand %p1736_p3, %p1735_p5 }
 0x572   : > { %p1103_p9 = pneg %p1102_p7 }
 0x574   : > { %1363 = dma.done.wait (%p1103_p9), %s849_s11, 16  }
 0x575   : > { %1365 = vsyncadd (%p1103_p9), %s849_s11, 4294967280  ;;  %p22_p8 = scmp.ge.s32.totalorder %s1503_s28, 4   ;;  %s1737_s18 = smov %s1372_s19 }
 0x576   : > { %s1738_s19 = smov %s1376_s20  ;;  %s1739_s20 = smov %s1513_s6 }
 0x577   : > { %s1740_s21 = smov %s1503_s28  ;;  %24 = sbr.rel (!%p22_p8) target bundleno = 8 (0x8), region = 114 }
 0x57c   :  { %853 = vsyncpa [#allocation3], 1 }
 0x57d   :  { %855 = vsyncpa [#allocation3 + $0x1], 1 }
 0x57e   :  { %856 = vsyncpa [#allocation6], 1 }
 0x57f   :  { %858 = vsyncpa [#allocation6 + $0x1], 1 }
 0x580   :  { %859 = vsyncpa [#allocation9], 1 }
 0x581   :  { %860 = vsyncpa [#allocation4], 1 }
 0x582   :  { %862 = vsyncpa [#allocation4 + $0x1], 1 }

</bundles_post_ra>
